<compile_context>
chip_gen: v5e
topology: v5e:2x2
jax: 0.10.0
libtpu: 0.0.40
codegen_flags: <defaults>
</compile_context>

<pallas_src>
import numpy as np
import jax
import jax.numpy as jnp
from jax.experimental import pallas as pl
from jax.experimental.pallas import tpu as pltpu

IGNORE_INDEX = 255
THRESHOLD = 4           # TMSE clamp threshold (loss clamped to threshold**2)
CE_WEIGHT = 1.0
TMSE_WEIGHT = 0.15


# ----------------------------------------------------------------------------
# Fused kernel.  One grid step processes B_BLK batch elements:
#   block preds (B_BLK, C, T), gts (B_BLK, 1, T), srcs (B_BLK, 2, T) int32
#   (row 0 = compaction map src[j] = original index of the j-th valid frame,
#    row 1 = src shifted by one == index of the (j+1)-th valid frame),
#   meta (B_BLK, 1, 3) int32 = [n_valid, first_valid_idx, last_valid_idx].
# Emits a packed (B_BLK, 1, 2) f32 output: [:, :, 0] = CE nll sum over valid
# frames, [:, :, 1] = clamped TMSE mean for that batch element.
# ----------------------------------------------------------------------------
def fused_loss_kernel(meta_ref, srcs_ref, preds_ref, gts_ref, out_ref):
    p = preds_ref[...].astype(jnp.float32)                 # (Bb, C, T)
    g = gts_ref[...]                                       # (Bb, 1, T) int32
    Bb, C, T = p.shape

    n = meta_ref[:, :, 0:1]                                # (Bb, 1, 1) valid count
    fv = meta_ref[:, :, 1:2]                               # first valid original idx
    lv = meta_ref[:, :, 2:3]                               # last valid original idx
    npairs = n - 1                                         # consecutive valid pairs

    col = jax.lax.broadcasted_iota(jnp.int32, (Bb, 1, T), 2)
    valid = g != IGNORE_INDEX                              # (Bb, 1, T) original order

    # ---------------- Cross entropy over the class (sublane) axis -----------
    mx = jnp.max(p, axis=1, keepdims=True)                                # (Bb,1,T)
    lse = mx + jnp.log(jnp.sum(jnp.exp(p - mx), axis=1, keepdims=True))
    cls = jax.lax.broadcasted_iota(jnp.int32, (Bb, C, 1), 1)
    g_safe = jnp.where(valid, g, 0)
    # NOTE: labels >= C (other than ignore_index) are silently treated as class 0
    # instead of raising like torch.nn.CrossEntropyLoss.
    tgt = jnp.sum(jnp.where(cls == g_safe, p, 0.0), axis=1, keepdims=True)
    nll = jnp.where(valid, lse - tgt, 0.0)                                # (Bb,1,T)
    ce_b = jnp.sum(jnp.sum(nll, axis=2, keepdims=True), axis=1, keepdims=True)

    # ---------------- TMSE (time-axis log-softmax of valid frames) ----------
    # Single exp pass over the valid frames; z_cur / z_prv are direct masked
    # sums (no tot - e_x cancellation).  logZ_cur - logZ_prv = log z_cur - log z_prv
    # since the shared row max cancels.
    neg_big = jnp.float32(-1e30)
    p_m = jnp.where(valid, p, neg_big)                     # (Bb, C, T)
    m_row = jnp.max(p_m, axis=2, keepdims=True)            # (Bb, C, 1)
    e = jnp.exp(p_m - m_row)                               # invalid cols underflow to 0
    z_cur = jnp.sum(jnp.where(valid & (col != fv), e, 0.0), axis=2, keepdims=True)
    z_prv = jnp.sum(jnp.where(valid & (col != lv), e, 0.0), axis=2, keepdims=True)
    tiny = jnp.float32(1e-30)
    delta = jnp.log(jnp.maximum(z_cur, tiny)) - jnp.log(jnp.maximum(z_prv, tiny))

    # Pairwise difference p[:, src[j+1]] - p[:, src[j]] via a single MXU
    # one-hot matmul built from the prefetched compaction map (no roll, no
    # permuted copy of p).
    src = srcs_ref[:, 0:1, :]                              # (Bb, 1, T)
    src_next = srcs_ref[:, 1:2, :]                         # (Bb, 1, T)
    t_iota = jax.lax.broadcasted_iota(jnp.int32, (Bb, T, T), 1)
    D = ((t_iota == src_next).astype(jnp.float32)
         - (t_iota == src).astype(jnp.float32))            # (Bb, T, T), entries {-1,0,1}
    d_raw = jnp.einsum('bct,btj->bcj', p, D,
                       preferred_element_type=jnp.float32)  # (Bb, C, T)

    d = d_raw - delta
    d2 = jnp.clip(d * d, 0.0, jnp.float32(THRESHOLD * THRESHOLD))
    pair_mask = col < npairs                               # pairs j = 0 .. n-2
    s = jnp.sum(jnp.sum(jnp.where(pair_mask, d2, 0.0), axis=2, keepdims=True),
                axis=1, keepdims=True)                     # (Bb, 1, 1)
    denom = jnp.maximum(npairs, 1).astype(jnp.float32) * jnp.float32(C)
    # n <= 1 valid frames -> PyTorch would produce NaN (mean of empty); we emit 0.
    tmse_b = jnp.where(npairs > 0, s / denom, jnp.zeros_like(s))

    # Packed output: lane 0 = CE sum, lane 1 = TMSE partial.
    lane = jax.lax.broadcasted_iota(jnp.int32, (Bb, 1, 2), 2)
    out_ref[...] = jnp.where(lane == 0, ce_b, tmse_b)


# ----------------------------------------------------------------------------
# Wrapper: cheap (B, T) int32 metadata in plain JAX, everything touching the
# big (B, C, T) preds tensor happens inside the fused kernel.
# ----------------------------------------------------------------------------
def action_segmentation_loss(preds, gts, feats=None, *, batch_block=8):
    del feats  # unused by the loss, kept to mirror the PyTorch forward signature
    B, C, T = preds.shape
    gts = gts.astype(jnp.int32)

    Bb = min(B, batch_block)
    B_pad = ((B + Bb - 1) // Bb) * Bb
    if B_pad != B:
        preds = jnp.concatenate(
            [preds, jnp.zeros((B_pad - B, C, T), preds.dtype)], axis=0)
        gts = jnp.concatenate(
            [gts, jnp.full((B_pad - B, T), IGNORE_INDEX, jnp.int32)], axis=0)

    # ---- O(B*T) int metadata (no pass over preds) ----
    valid = gts != IGNORE_INDEX                                      # (B_pad, T)
    nvalid = jnp.sum(valid, axis=1).astype(jnp.int32)                # (B_pad,)
    t_idx = jnp.arange(T, dtype=jnp.int32)
    first_valid = jnp.min(jnp.where(valid, t_idx[None, :], T), axis=1).astype(jnp.int32)
    last_valid = jnp.max(jnp.where(valid, t_idx[None, :], -1), axis=1).astype(jnp.int32)
    dest = jnp.where(valid, jnp.cumsum(valid, axis=1) - 1, T - 1).astype(jnp.int32)
    t_full = jnp.broadcast_to(t_idx[None, :], (B_pad, T))
    b_full = jnp.broadcast_to(jnp.arange(B_pad, dtype=jnp.int32)[:, None], (B_pad, T))
    # src[b, j] = original time index of the j-th valid frame (tail is garbage,
    # masked inside the kernel via the pair mask col < n-1).
    src = jnp.zeros((B_pad, T), jnp.int32).at[b_full, dest].set(t_full)
    src_next = jnp.roll(src, -1, axis=1)                             # src[j+1]
    srcs = jnp.stack([src, src_next], axis=1)                        # (B_pad, 2, T)
    meta = jnp.stack([nvalid, first_valid, last_valid], axis=-1)[:, None, :]  # (B_pad,1,3)
    gts_in = gts[:, None, :]                                         # (B_pad, 1, T)

    # ---- VMEM budget derived from the actual block shapes (v7x-friendly) ----
    itemsize = jnp.dtype(preds.dtype).itemsize
    in_block = Bb * (C * T * itemsize + 3 * T * 4 + 3 * 4)           # preds + srcs + gts + meta
    vmem_need = 2 * in_block + 3 * Bb * T * T * 4 + 8 * Bb * C * T * 4 + (2 << 20)
    vmem_limit = int(min(max(vmem_need, 8 << 20), 64 << 20))

    parts = pl.pallas_call(
        fused_loss_kernel,
        out_shape=jax.ShapeDtypeStruct((B_pad, 1, 2), jnp.float32),
        grid_spec=pltpu.PrefetchScalarGridSpec(
            num_scalar_prefetch=0,
            grid=(B_pad // Bb,),
            in_specs=[
                pl.BlockSpec((Bb, 1, 3), lambda i: (i, 0, 0)),   # meta
                pl.BlockSpec((Bb, 2, T), lambda i: (i, 0, 0)),   # srcs
                pl.BlockSpec((Bb, C, T), lambda i: (i, 0, 0)),   # preds (native dtype)
                pl.BlockSpec((Bb, 1, T), lambda i: (i, 0, 0)),   # gts
            ],
            out_specs=pl.BlockSpec((Bb, 1, 2), lambda i: (i, 0, 0)),
        ),
        compiler_params=pltpu.CompilerParams(
            dimension_semantics=("parallel",),       # megacore-shardable on v7x
            vmem_limit_bytes=vmem_limit,
        ),
    )(meta, srcs, preds, gts_in)

    total_valid = jnp.sum(nvalid).astype(jnp.float32)   # padded rows contribute 0
    # NOTE: an all-ignored input divides by zero -> nan, matching PyTorch's
    # CrossEntropyLoss behavior when every target equals ignore_index.
    ce = jnp.sum(parts[:, 0, 0]) / total_valid
    tmse = jnp.sum(parts[:, 0, 1]) / B
    return CE_WEIGHT * ce + TMSE_WEIGHT * tmse


# ----------------------------------------------------------------------------
# Pure-numpy reference that mirrors the PyTorch forward exactly.
# ----------------------------------------------------------------------------
def reference_loss(preds, gts):
    preds = np.asarray(preds, dtype=np.float64)
    gts = np.asarray(gts)
    B, C, T = preds.shape

    def log_softmax(x, axis):
        m = x.max(axis=axis, keepdims=True)
        return x - m - np.log(np.exp(x - m).sum(axis=axis, keepdims=True))

    # CrossEntropyLoss(ignore_index=255, reduction='mean')
    ls = log_softmax(preds, axis=1)
    tot, cnt = 0.0, 0
    for b in range(B):
        for t in range(T):
            if gts[b, t] != IGNORE_INDEX:
                tot += -ls[b, gts[b, t], t]
                cnt += 1
    ce = tot / cnt

    # TMSE (log_softmax over dim=1 of the (C, T_valid-1) slice == time axis)
    total = 0.0
    for b in range(B):
        sel = preds[b][:, gts[b] != IGNORE_INDEX]
        a = log_softmax(sel[:, 1:], axis=1)
        c = log_softmax(sel[:, :-1], axis=1)
        loss = np.clip((a - c) ** 2, 0, THRESHOLD ** 2)
        total += loss.mean()
    tmse = total / B

    return CE_WEIGHT * ce + TMSE_WEIGHT * tmse


if __name__ == "__main__":
    key = jax.random.PRNGKey(0)
    k1, k2 = jax.random.split(key)

    B, C, T = 2, 8, 128
    preds = jax.random.normal(k1, (B, C, T), dtype=jnp.float32)
    gts = jax.random.randint(k2, (B, T), 0, C, dtype=jnp.int32)
    # sprinkle some ignore_index frames (isolated, a run, and at the edges)
    gts = gts.at[0, 5].set(IGNORE_INDEX)
    gts = gts.at[0, 6].set(IGNORE_INDEX)
    gts = gts.at[0, 40:44].set(IGNORE_INDEX)
    gts = gts.at[1, 0].set(IGNORE_INDEX)
    gts = gts.at[1, 17].set(IGNORE_INDEX)
    gts = gts.at[1, 127].set(IGNORE_INDEX)

    loss = jax.jit(action_segmentation_loss)(preds, gts)
    loss = jax.block_until_ready(loss)

    ref = reference_loss(preds, gts)
    np.testing.assert_allclose(float(loss), float(ref), rtol=2e-3, atol=2e-3)

    print("KERNEL_OK")
</pallas_src>

<mosaic_0001>
module attributes {stable_mosaic.version = 11 : i64} {
  func.func @fused_loss_kernel(%arg0: i32, %arg1: memref<2x1x3xi32, #tpu.memory_space<vmem>>, %arg2: memref<2x2x128xi32, #tpu.memory_space<vmem>>, %arg3: memref<2x8x128xf32, #tpu.memory_space<vmem>>, %arg4: memref<2x1x128xi32, #tpu.memory_space<vmem>>, %arg5: memref<2x1x2xf32, #tpu.memory_space<vmem>>) attributes {dimension_semantics = [#tpu.dimension_semantics<parallel>], iteration_bounds = array<i64: 1>, scalar_prefetch = 0 : i64, scratch_operands = 0 : i64, tpu.core_type = #tpu.core_type<tc>, window_params = [{transform_indices = @transform_0, window_bounds = array<i64: 2, 1, 3>}, {transform_indices = @transform_1, window_bounds = array<i64: 2, 2, 128>}, {transform_indices = @transform_2, window_bounds = array<i64: 2, 8, 128>}, {transform_indices = @transform_3, window_bounds = array<i64: 2, 1, 128>}, {transform_indices = @transform_4, window_bounds = array<i64: 2, 1, 2>}]} {
    %c0 = arith.constant 0 : index
    %c0_0 = arith.constant 0 : index
    %c0_1 = arith.constant 0 : index
    %0 = vector.load %arg3[%c0, %c0_0, %c0_1] : memref<2x8x128xf32, #tpu.memory_space<vmem>>, vector<2x8x128xf32>
    %c0_2 = arith.constant 0 : index
    %c0_3 = arith.constant 0 : index
    %c0_4 = arith.constant 0 : index
    %1 = vector.load %arg4[%c0_2, %c0_3, %c0_4] : memref<2x1x128xi32, #tpu.memory_space<vmem>>, vector<2x1x128xi32>
    %c0_5 = arith.constant 0 : index
    %c0_6 = arith.constant 0 : index
    %c0_7 = arith.constant 0 : index
    %2 = vector.load %arg1[%c0_5, %c0_6, %c0_7] : memref<2x1x3xi32, #tpu.memory_space<vmem>>, vector<2x1x1xi32>
    %c0_8 = arith.constant 0 : index
    %c0_9 = arith.constant 0 : index
    %c1 = arith.constant 1 : index
    %3 = vector.load %arg1[%c0_8, %c0_9, %c1] : memref<2x1x3xi32, #tpu.memory_space<vmem>>, vector<2x1x1xi32>
    %c0_10 = arith.constant 0 : index
    %c0_11 = arith.constant 0 : index
    %c2 = arith.constant 2 : index
    %4 = vector.load %arg1[%c0_10, %c0_11, %c2] : memref<2x1x3xi32, #tpu.memory_space<vmem>>, vector<2x1x1xi32>
    %c1_i32 = arith.constant 1 : i32
    %5 = vector.broadcast %c1_i32 : i32 to vector<2x1x1xi32>
    %6 = arith.subi %2, %5 : vector<2x1x1xi32>
    %7 = tpu.iota {dimensions = array<i32: 2>} : vector<2x1x128xi32>
    %c255_i32 = arith.constant 255 : i32
    %8 = vector.broadcast %c255_i32 : i32 to vector<2x1x128xi32>
    %9 = arith.cmpi ne, %1, %8 : vector<2x1x128xi32>
    %cst = arith.constant dense<0xFF800000> : vector<2x128xf32>
    %10 = vector.multi_reduction <maximumf>, %0, %cst [1] : vector<2x8x128xf32> to vector<2x128xf32>
    %11 = vector.shape_cast %10 : vector<2x128xf32> to vector<2x1x128xf32>
    %12 = vector.broadcast %11 : vector<2x1x128xf32> to vector<2x8x128xf32>
    %13 = arith.subf %0, %12 : vector<2x8x128xf32>
    %14 = math.exp %13 : vector<2x8x128xf32>
    %cst_12 = arith.constant dense<0.000000e+00> : vector<2x128xf32>
    %15 = vector.multi_reduction <add>, %14, %cst_12 [1] : vector<2x8x128xf32> to vector<2x128xf32>
    %16 = vector.shape_cast %15 : vector<2x128xf32> to vector<2x1x128xf32>
    %17 = math.log %16 : vector<2x1x128xf32>
    %18 = arith.addf %11, %17 : vector<2x1x128xf32>
    %19 = tpu.iota {dimensions = array<i32: 1>} : vector<2x8x1xi32>
    %c0_i32 = arith.constant 0 : i32
    %20 = vector.broadcast %c0_i32 : i32 to vector<2x1x128xi32>
    %21 = arith.select %9, %1, %20 : vector<2x1x128xi1>, vector<2x1x128xi32>
    %22 = vector.broadcast %19 : vector<2x8x1xi32> to vector<2x8x128xi32>
    %23 = vector.broadcast %21 : vector<2x1x128xi32> to vector<2x8x128xi32>
    %24 = arith.cmpi eq, %22, %23 : vector<2x8x128xi32>
    %cst_13 = arith.constant 0.000000e+00 : f32
    %25 = vector.broadcast %cst_13 : f32 to vector<2x8x128xf32>
    %26 = arith.select %24, %0, %25 : vector<2x8x128xi1>, vector<2x8x128xf32>
    %cst_14 = arith.constant dense<0.000000e+00> : vector<2x128xf32>
    %27 = vector.multi_reduction <add>, %26, %cst_14 [1] : vector<2x8x128xf32> to vector<2x128xf32>
    %28 = vector.shape_cast %27 : vector<2x128xf32> to vector<2x1x128xf32>
    %29 = arith.subf %18, %28 : vector<2x1x128xf32>
    %cst_15 = arith.constant 0.000000e+00 : f32
    %30 = vector.broadcast %cst_15 : f32 to vector<2x1x128xf32>
    %31 = arith.select %9, %29, %30 : vector<2x1x128xi1>, vector<2x1x128xf32>
    %cst_16 = arith.constant dense<0.000000e+00> : vector<2x1xf32>
    %32 = vector.multi_reduction <add>, %31, %cst_16 [2] : vector<2x1x128xf32> to vector<2x1xf32>
    %33 = vector.shape_cast %32 : vector<2x1xf32> to vector<2x1x1xf32>
    %cst_17 = arith.constant dense<0.000000e+00> : vector<2x1xf32>
    %34 = vector.multi_reduction <add>, %33, %cst_17 [1] : vector<2x1x1xf32> to vector<2x1xf32>
    %35 = vector.shape_cast %34 : vector<2x1xf32> to vector<2x1x1xf32>
    %cst_18 = arith.constant -1.000000e+30 : f32
    %36 = vector.shape_cast %9 : vector<2x1x128xi1> to vector<2x1x128xi1>
    %37 = vector.broadcast %36 : vector<2x1x128xi1> to vector<2x8x128xi1>
    %38 = vector.broadcast %cst_18 : f32 to vector<2x8x128xf32>
    %39 = arith.select %37, %0, %38 : vector<2x8x128xi1>, vector<2x8x128xf32>
    %cst_19 = arith.constant dense<0xFF800000> : vector<2x8xf32>
    %40 = vector.multi_reduction <maximumf>, %39, %cst_19 [2] : vector<2x8x128xf32> to vector<2x8xf32>
    %41 = vector.shape_cast %40 : vector<2x8xf32> to vector<2x8x1xf32>
    %42 = vector.broadcast %41 : vector<2x8x1xf32> to vector<2x8x128xf32>
    %43 = arith.subf %39, %42 : vector<2x8x128xf32>
    %44 = math.exp %43 : vector<2x8x128xf32>
    %45 = vector.broadcast %3 : vector<2x1x1xi32> to vector<2x1x128xi32>
    %46 = arith.cmpi ne, %7, %45 : vector<2x1x128xi32>
    %47 = arith.andi %9, %46 : vector<2x1x128xi1>
    %cst_20 = arith.constant 0.000000e+00 : f32
    %48 = vector.shape_cast %47 : vector<2x1x128xi1> to vector<2x1x128xi1>
    %49 = vector.broadcast %48 : vector<2x1x128xi1> to vector<2x8x128xi1>
    %50 = vector.broadcast %cst_20 : f32 to vector<2x8x128xf32>
    %51 = arith.select %49, %44, %50 : vector<2x8x128xi1>, vector<2x8x128xf32>
    %cst_21 = arith.constant dense<0.000000e+00> : vector<2x8xf32>
    %52 = vector.multi_reduction <add>, %51, %cst_21 [2] : vector<2x8x128xf32> to vector<2x8xf32>
    %53 = vector.shape_cast %52 : vector<2x8xf32> to vector<2x8x1xf32>
    %54 = vector.broadcast %4 : vector<2x1x1xi32> to vector<2x1x128xi32>
    %55 = arith.cmpi ne, %7, %54 : vector<2x1x128xi32>
    %56 = arith.andi %9, %55 : vector<2x1x128xi1>
    %cst_22 = arith.constant 0.000000e+00 : f32
    %57 = vector.shape_cast %56 : vector<2x1x128xi1> to vector<2x1x128xi1>
    %58 = vector.broadcast %57 : vector<2x1x128xi1> to vector<2x8x128xi1>
    %59 = vector.broadcast %cst_22 : f32 to vector<2x8x128xf32>
    %60 = arith.select %58, %44, %59 : vector<2x8x128xi1>, vector<2x8x128xf32>
    %cst_23 = arith.constant dense<0.000000e+00> : vector<2x8xf32>
    %61 = vector.multi_reduction <add>, %60, %cst_23 [2] : vector<2x8x128xf32> to vector<2x8xf32>
    %62 = vector.shape_cast %61 : vector<2x8xf32> to vector<2x8x1xf32>
    %cst_24 = arith.constant 1.000000e-30 : f32
    %63 = vector.broadcast %cst_24 : f32 to vector<2x8x1xf32>
    %64 = arith.maximumf %53, %63 : vector<2x8x1xf32>
    %65 = math.log %64 : vector<2x8x1xf32>
    %cst_25 = arith.constant 1.000000e-30 : f32
    %66 = vector.broadcast %cst_25 : f32 to vector<2x8x1xf32>
    %67 = arith.maximumf %62, %66 : vector<2x8x1xf32>
    %68 = math.log %67 : vector<2x8x1xf32>
    %69 = arith.subf %65, %68 : vector<2x8x1xf32>
    %c0_26 = arith.constant 0 : index
    %c0_27 = arith.constant 0 : index
    %c0_28 = arith.constant 0 : index
    %70 = vector.load %arg2[%c0_26, %c0_27, %c0_28] : memref<2x2x128xi32, #tpu.memory_space<vmem>>, vector<2x1x128xi32>
    %c0_29 = arith.constant 0 : index
    %c1_30 = arith.constant 1 : index
    %c0_31 = arith.constant 0 : index
    %71 = vector.load %arg2[%c0_29, %c1_30, %c0_31] : memref<2x2x128xi32, #tpu.memory_space<vmem>>, vector<2x1x128xi32>
    %72 = tpu.iota {dimensions = array<i32: 1>} : vector<2x128x128xi32>
    %73 = vector.broadcast %71 : vector<2x1x128xi32> to vector<2x128x128xi32>
    %74 = arith.cmpi eq, %72, %73 : vector<2x128x128xi32>
    %75 = arith.extui %74 : vector<2x128x128xi1> to vector<2x128x128xi32>
    %76 = arith.sitofp %75 : vector<2x128x128xi32> to vector<2x128x128xf32>
    %77 = vector.broadcast %70 : vector<2x1x128xi32> to vector<2x128x128xi32>
    %78 = arith.cmpi eq, %72, %77 : vector<2x128x128xi32>
    %79 = arith.extui %78 : vector<2x128x128xi1> to vector<2x128x128xi32>
    %80 = arith.sitofp %79 : vector<2x128x128xi32> to vector<2x128x128xf32>
    %81 = arith.subf %76, %80 : vector<2x128x128xf32>
    "tpu.trace_start"() <{level = 10 : i32, message = "bct,btj->bcj"}> : () -> ()
    %cst_32 = arith.constant dense<0.000000e+00> : vector<2x8x128xf32>
    %82 = tpu.matmul %0, %81, %cst_32 {dimension_numbers = #tpu.dot_dimension_numbers<[2], [1], [1], [2], [0, 0, 0, 1, 1, 2], [0], [0]>} : vector<2x8x128xf32>, vector<2x128x128xf32>, vector<2x8x128xf32> -> vector<2x8x128xf32>
    "tpu.trace_stop"() : () -> ()
    %83 = vector.broadcast %69 : vector<2x8x1xf32> to vector<2x8x128xf32>
    %84 = arith.subf %82, %83 : vector<2x8x128xf32>
    %85 = arith.mulf %84, %84 : vector<2x8x128xf32>
    %cst_33 = arith.constant 0.000000e+00 : f32
    %cst_34 = arith.constant 1.600000e+01 : f32
    %86 = vector.broadcast %cst_33 : f32 to vector<2x8x128xf32>
    %87 = arith.maximumf %86, %85 : vector<2x8x128xf32>
    %88 = vector.broadcast %cst_34 : f32 to vector<2x8x128xf32>
    %89 = arith.minimumf %88, %87 : vector<2x8x128xf32>
    %90 = vector.broadcast %6 : vector<2x1x1xi32> to vector<2x1x128xi32>
    %91 = arith.cmpi slt, %7, %90 : vector<2x1x128xi32>
    %cst_35 = arith.constant 0.000000e+00 : f32
    %92 = vector.shape_cast %91 : vector<2x1x128xi1> to vector<2x1x128xi1>
    %93 = vector.broadcast %92 : vector<2x1x128xi1> to vector<2x8x128xi1>
    %94 = vector.broadcast %cst_35 : f32 to vector<2x8x128xf32>
    %95 = arith.select %93, %89, %94 : vector<2x8x128xi1>, vector<2x8x128xf32>
    %cst_36 = arith.constant dense<0.000000e+00> : vector<2x8xf32>
    %96 = vector.multi_reduction <add>, %95, %cst_36 [2] : vector<2x8x128xf32> to vector<2x8xf32>
    %97 = vector.shape_cast %96 : vector<2x8xf32> to vector<2x8x1xf32>
    %cst_37 = arith.constant dense<0.000000e+00> : vector<2x1xf32>
    %98 = vector.multi_reduction <add>, %97, %cst_37 [1] : vector<2x8x1xf32> to vector<2x1xf32>
    %99 = vector.shape_cast %98 : vector<2x1xf32> to vector<2x1x1xf32>
    %c1_i32_38 = arith.constant 1 : i32
    %100 = vector.broadcast %c1_i32_38 : i32 to vector<2x1x1xi32>
    %101 = arith.maxsi %6, %100 : vector<2x1x1xi32>
    %102 = arith.sitofp %101 : vector<2x1x1xi32> to vector<2x1x1xf32>
    %cst_39 = arith.constant 8.000000e+00 : f32
    %103 = vector.broadcast %cst_39 : f32 to vector<2x1x1xf32>
    %104 = arith.mulf %102, %103 : vector<2x1x1xf32>
    %c0_i32_40 = arith.constant 0 : i32
    %105 = vector.broadcast %c0_i32_40 : i32 to vector<2x1x1xi32>
    %106 = arith.cmpi sgt, %6, %105 : vector<2x1x1xi32>
    %107 = arith.divf %99, %104 : vector<2x1x1xf32>
    %cst_41 = arith.constant 0.000000e+00 : f32
    %108 = vector.broadcast %cst_41 : f32 to vector<2x1x1xf32>
    %109 = arith.select %106, %107, %108 : vector<2x1x1xi1>, vector<2x1x1xf32>
    %110 = tpu.iota {dimensions = array<i32: 2>} : vector<2x1x2xi32>
    %c0_i32_42 = arith.constant 0 : i32
    %111 = vector.broadcast %c0_i32_42 : i32 to vector<2x1x2xi32>
    %112 = arith.cmpi eq, %110, %111 : vector<2x1x2xi32>
    %113 = vector.shape_cast %35 : vector<2x1x1xf32> to vector<2x1x1xf32>
    %114 = vector.broadcast %113 : vector<2x1x1xf32> to vector<2x1x2xf32>
    %115 = vector.shape_cast %109 : vector<2x1x1xf32> to vector<2x1x1xf32>
    %116 = vector.broadcast %115 : vector<2x1x1xf32> to vector<2x1x2xf32>
    %117 = arith.select %112, %114, %116 : vector<2x1x2xi1>, vector<2x1x2xf32>
    %c0_43 = arith.constant 0 : index
    %c0_44 = arith.constant 0 : index
    %c0_45 = arith.constant 0 : index
    %118 = vector.load %arg5[%c0_43, %c0_44, %c0_45] : memref<2x1x2xf32, #tpu.memory_space<vmem>>, vector<2x1x2xf32>
    tpu.vector_store %arg5[%c0_43, %c0_44, %c0_45], %117 {strides = array<i32>} : memref<2x1x2xf32, #tpu.memory_space<vmem>>, vector<2x1x2xf32>,
    return
  }
  func.func @transform_0(%arg0: i32) -> (i32, i32, i32) {
    %c0_i32 = arith.constant 0 : i32
    %c0_i32_0 = arith.constant 0 : i32
    %c0_i32_1 = arith.constant 0 : i32
    return %arg0, %c0_i32, %c0_i32_0 : i32, i32, i32
  }
  func.func @transform_1(%arg0: i32) -> (i32, i32, i32) {
    %c0_i32 = arith.constant 0 : i32
    %c0_i32_0 = arith.constant 0 : i32
    %c0_i32_1 = arith.constant 0 : i32
    return %arg0, %c0_i32, %c0_i32_0 : i32, i32, i32
  }
  func.func @transform_2(%arg0: i32) -> (i32, i32, i32) {
    %c0_i32 = arith.constant 0 : i32
    %c0_i32_0 = arith.constant 0 : i32
    %c0_i32_1 = arith.constant 0 : i32
    return %arg0, %c0_i32, %c0_i32_0 : i32, i32, i32
  }
  func.func @transform_3(%arg0: i32) -> (i32, i32, i32) {
    %c0_i32 = arith.constant 0 : i32
    %c0_i32_0 = arith.constant 0 : i32
    %c0_i32_1 = arith.constant 0 : i32
    return %arg0, %c0_i32, %c0_i32_0 : i32, i32, i32
  }
  func.func @transform_4(%arg0: i32) -> (i32, i32, i32) {
    %c0_i32 = arith.constant 0 : i32
    %c0_i32_0 = arith.constant 0 : i32
    %c0_i32_1 = arith.constant 0 : i32
    return %arg0, %c0_i32, %c0_i32_0 : i32, i32, i32
  }
}

</mosaic_0001>

<bundles_post_ra>
// kernel: action_segmentation_loss.1
= control target key start
LH: loop header
LB: loop body
LE: loop exit
PB: predicated region body
PF: predicated region fallthrough
CT: control target
= control target key end

     0   :  { %v25_v0 = vlaneseq  ;;  %v674_v1 = vmov 1   ;;  %v675_v4 = vmov 2   ;;  %v676_v5 = vmov 0   ;;  %s1059_s0 = inlined_call_operand.vmem [shape: s32[2,1,3], index: 0, kind: input, shape index: {}]   ;;  %s1060_s3 = inlined_call_operand.vmem [shape: s32[2,1,128], index: 3, kind: input, shape index: {}]   ;;  %s1061_s2 = inlined_call_operand.vmem [shape: f32[2,8,128], index: 2, kind: input, shape index: {}]   ;;  %s1062_s1 = inlined_call_operand.vmem [shape: s32[2,2,128], index: 1, kind: input, shape index: {}]   ;;  %s1063_s4 = inlined_call_operand.vmem [shape: f32[2,1,2], index: 4, kind: output, shape index: {}]  }
   0x1   :  { %641 = vset.pattern.permute.xlu1 %v674_v1  ;;  %v706_v2 = vld [vmem:[%s1059_s0] sm:$0x1]  ;;  %642 = vset.pattern.permute.xlu2 %v675_v4  ;;  %v722_v7 = vld [vmem:[%s1060_s3 + $0x1] sm:$0x1]  ;;  %v760_v18 = vld [vmem:[%s1061_s2 + $0x8] sm:$0xff]  ;;  %v677_v22 = vmov 0.0  }
   0x2   :  { %v711_v3 = vld [vmem:[%s1060_s3] sm:$0x1]  ;;  %119 = vperm.xlu1 %641, %v706_v2   ;;  %143 = vperm.xlu2 %642, %v706_v2   ;;  %v725_v8 = vshrl.u32 %v25_v0, 7  ;;  %vm28_vm1 = vcmp.ne.s32.totalorder %v722_v7, 255  ;;  %v740_v12 = vld [vmem:[%s1059_s0 + $0x1] sm:$0x1] }
   0x3   :  { %vm27_vm0 = vcmp.ne.s32.totalorder %v711_v3, 255  ;;  %643 = vset.pattern.permute.xlu0 %v676_v5  ;;  %v731_v9 = vld [vmem:[%s1061_s2] sm:$0xff]  ;;  %v101_v11 = vsel %vm28_vm1, 1, %v676_v5 }
   0x4   :  { %v100_v6 = vsel %vm27_vm0, 1, %v676_v5  ;;  %v745_v13 = vld [vmem:[%s1062_s1 + $0x1] ss:$0 sm:$0xff]  ;;  %v103_v15 = vperm.slane %v101_v11, 0  ;;  %v198_v16 = vadd.s32 120, %v725_v8  ;;  %v197_v19 = vadd.s32 112, %v725_v8 }
   0x5   :  { %v102_v10 = vperm.slane %v100_v6, 0  ;;  %v754_v17 = vld [vmem:[%s1062_s1] ss:$0 sm:$0xff]  ;;  %v764_v20 = vadd.s32 104, %v725_v8  ;;  %v769_v21 = vadd.s32 96, %v725_v8  ;;  %v804_v36 = vadd.s32 88, %v725_v8 }
   0x6   :  { %vm105_vm3 = vcmp.eq.s32.totalorder %v103_v15, 1  ;;  %vm216_vm4 = vcmp.eq.s32.totalorder %v198_v16, %v745_v13  ;;  %vm314_vm5 = vcmp.eq.s32.totalorder %v198_v16, %v754_v17  ;;  %vm215_vm6 = vcmp.eq.s32.totalorder %v197_v19, %v745_v13  ;;  %v783_v27 = vld [vmem:[%s1062_s1 + $0x3] ss:$0 sm:$0xff]  ;;  %v788_v28 = vld [vmem:[%s1062_s1 + $0x2] ss:$0 sm:$0xff] }
   0x7   :  { %vm104_vm2 = vcmp.eq.s32.totalorder %v102_v10, 1  ;;  %v588_v23 = vsel %vm216_vm4, 1.0, %v677_v22  ;;  %v620_v24 = vsel %vm314_vm5, 1.0, %v677_v22  ;;  %v776_v25 = vsel %vm105_vm3, %v760_v18, -1e+30 }
   0x8   :  { %v748_v14 = vsel %vm104_vm2, %v731_v9, -1e+30  ;;  %v410_v26 = vsub.f32 %v588_v23, %v620_v24  ;;  %vm313_vm7 = vcmp.eq.s32.totalorder %v197_v19, %v754_v17  ;;  %v587_v29 = vsel %vm215_vm6, 1.0, %v677_v22 }
   0x9   :  { %108 = vmax.xlane.f32.xlu0 %v748_v14  ;;  %v619_v30 = vsel %vm313_vm7, 1.0, %v677_v22  ;;  %vm214_vm8 = vcmp.eq.s32.totalorder %v764_v20, %v745_v13  ;;  %vm312_vm9 = vcmp.eq.s32.totalorder %v764_v20, %v754_v17  ;;  %vm213_vm10 = vcmp.eq.s32.totalorder %v769_v21, %v745_v13 }
   0xa   :  { %123 = vperm.xlu1 %641, %v740_v12   ;;  %147 = vperm.xlu2 %642, %v740_v12   ;;  %v409_v31 = vsub.f32 %v587_v29, %v619_v30  ;;  %v586_v32 = vsel %vm214_vm8, 1.0, %v677_v22  ;;  %v618_v33 = vsel %vm312_vm9, 1.0, %v677_v22  ;;  %v585_v35 = vsel %vm213_vm10, 1.0, %v677_v22 }
   0xb   :  { %427 = vmatpush.msra.mxu0 %v410_v26  ;;  %v408_v34 = vsub.f32 %v586_v32, %v618_v33  ;;  %vm311_vm11 = vcmp.eq.s32.totalorder %v769_v21, %v754_v17  ;;  %vm232_vm12 = vcmp.eq.s32.totalorder %v198_v16, %v783_v27  ;;  %vm330_vm13 = vcmp.eq.s32.totalorder %v198_v16, %v788_v28 }
   0xc   :  { %v617_v37 = vsel %vm311_vm11, 1.0, %v677_v22  ;;  %v810_v38 = vadd.s32 80, %v725_v8  ;;  %vm212_vm14 = vcmp.eq.s32.totalorder %v804_v36, %v745_v13  ;;  %vm310_vm15 = vcmp.eq.s32.totalorder %v804_v36, %v754_v17 }
   0xd   :  { %428 = vmatpush.msra.mxu0 %v409_v31  ;;  %v407_v39 = vsub.f32 %v585_v35, %v617_v37  ;;  %v604_v40 = vsel %vm232_vm12, 1.0, %v677_v22  ;;  %v584_v41 = vsel %vm212_vm14, 1.0, %v677_v22  ;;  %v616_v42 = vsel %vm310_vm15, 1.0, %v677_v22 }
   0xe   :  { %v636_v43 = vsel %vm330_vm13, 1.0, %v677_v22  ;;  %vm211_vm2 = vcmp.eq.s32.totalorder %v810_v38, %v745_v13  ;;  %v406_v44 = vsub.f32 %v584_v41, %v616_v42  ;;  %vm309_vm3 = vcmp.eq.s32.totalorder %v810_v38, %v754_v17 }
   0xf   :  { %429 = vmatpush.msra.mxu0 %v408_v34  ;;  %v426_v45 = vsub.f32 %v604_v40, %v636_v43  ;;  %v583_v46 = vsel %vm211_vm2, 1.0, %v677_v22  ;;  %v615_v47 = vsel %vm309_vm3, 1.0, %v677_v22  ;;  %vm231_vm4 = vcmp.eq.s32.totalorder %v197_v19, %v783_v27 }
  0x10   :  { %vm329_vm5 = vcmp.eq.s32.totalorder %v197_v19, %v788_v28  ;;  %v405_v48 = vsub.f32 %v583_v46, %v615_v47  ;;  %v603_v49 = vsel %vm231_vm4, 1.0, %v677_v22  ;;  %v192_v52 = vadd.s32 72, %v725_v8 }
  0x11   :  { %110 = vmax.xlane.f32.xlu0 %v776_v25  ;;  %430 = vmatpush.msra.mxu0 %v407_v39  ;;  %v635_v50 = vsel %vm329_vm5, 1.0, %v677_v22  ;;  %vm230_vm8 = vcmp.eq.s32.totalorder %v764_v20, %v783_v27  ;;  %vm328_vm9 = vcmp.eq.s32.totalorder %v764_v20, %v788_v28  ;;  %v191_v59 = vadd.s32 64, %v725_v8 }
  0x12   :  { %644 = vset.pattern.permute.xlu2 %v676_v5  ;;  %645 = vset.pattern.permute.xlu1 %v676_v5  ;;  %v425_v51 = vsub.f32 %v603_v49, %v635_v50  ;;  %vm210_vm6 = vcmp.eq.s32.totalorder %v192_v52, %v745_v13  ;;  %vm308_vm7 = vcmp.eq.s32.totalorder %v192_v52, %v754_v17  ;;  %v602_v55 = vsel %vm230_vm8, 1.0, %v677_v22 }
  0x13   :  { %447 = vmatpush.msra.mxu1 %v426_v45  ;;  %431 = vmatpush.msra.mxu0 %v406_v44  ;;  %v582_v53 = vsel %vm210_vm6, 1.0, %v677_v22  ;;  %v614_v54 = vsel %vm308_vm7, 1.0, %v677_v22  ;;  %v634_v56 = vsel %vm328_vm9, 1.0, %v677_v22  ;;  %vm229_vm10 = vcmp.eq.s32.totalorder %v769_v21, %v783_v27 }
  0x14   :  { %v404_v57 = vsub.f32 %v582_v53, %v614_v54  ;;  %v424_v58 = vsub.f32 %v602_v55, %v634_v56  ;;  %v601_v60 = vsel %vm229_vm10, 1.0, %v677_v22  ;;  %vm327_vm11 = vcmp.eq.s32.totalorder %v769_v21, %v788_v28 }
  0x15   :  { %432 = vmatpush.msra.mxu0 %v405_v48  ;;  %448 = vmatpush.msra.mxu1 %v425_v51  ;;  %v851_v61 = vadd.s32 56, %v725_v8  ;;  %vm209_vm12 = vcmp.eq.s32.totalorder %v191_v59, %v745_v13  ;;  %vm307_vm13 = vcmp.eq.s32.totalorder %v191_v59, %v754_v17  ;;  %v633_v62 = vsel %vm327_vm11, 1.0, %v677_v22 }
  0x16   :  { %vm228_vm14 = vcmp.eq.s32.totalorder %v804_v36, %v783_v27  ;;  %v581_v63 = vsel %vm209_vm12, 1.0, %v677_v22  ;;  %v613_v1 = vsel %vm307_vm13, 1.0, %v677_v22  ;;  %v423_v4 = vsub.f32 %v601_v60, %v633_v62 }
  0x17   :  { %433 = vmatpush.msra.mxu0 %v404_v57  ;;  %449 = vmatpush.msra.mxu1 %v424_v58  ;;  %vm208_vm15 = vcmp.eq.s32.totalorder %v851_v61, %v745_v13  ;;  %v403_v6 = vsub.f32 %v581_v63, %v613_v1  ;;  %vm306_vm2 = vcmp.eq.s32.totalorder %v851_v61, %v754_v17  ;;  %v600_v11 = vsel %vm228_vm14, 1.0, %v677_v22 }
  0x18   :  { %v580_v10 = vsel %vm208_vm15, 1.0, %v677_v22  ;;  %v612_v15 = vsel %vm306_vm2, 1.0, %v677_v22  ;;  %vm326_vm3 = vcmp.eq.s32.totalorder %v804_v36, %v788_v28  ;;  %v189_v16 = vadd.s32 48, %v725_v8 }
  0x19   :  { %450 = vmatpush.msra.mxu1 %v423_v4  ;;  %vm227_vm4 = vcmp.eq.s32.totalorder %v810_v38, %v783_v27  ;;  %434 = vmatpush.msra.mxu0 %v403_v6  ;;  %v402_v19 = vsub.f32 %v580_v10, %v612_v15  ;;  %v632_v20 = vsel %vm326_vm3, 1.0, %v677_v22  ;;  %vm325_vm5 = vcmp.eq.s32.totalorder %v810_v38, %v788_v28 }
  0x1a   :  { %v599_v21 = vsel %vm227_vm4, 1.0, %v677_v22  ;;  %v422_v23 = vsub.f32 %v600_v11, %v632_v20  ;;  %vm207_vm6 = vcmp.eq.s32.totalorder %v189_v16, %v745_v13  ;;  %vm305_vm7 = vcmp.eq.s32.totalorder %v189_v16, %v754_v17 }
  0x1b   :  { %435 = vmatpush.msra.mxu0 %v402_v19  ;;  %v579_v24 = vsel %vm207_vm6, 1.0, %v677_v22  ;;  %v611_v26 = vsel %vm305_vm7, 1.0, %v677_v22  ;;  %v631_v29 = vsel %vm325_vm5, 1.0, %v677_v22  ;;  %v882_v30 = vadd.s32 40, %v725_v8 }
  0x1c   :  { %451 = vmatpush.msra.mxu1 %v422_v23  ;;  %v401_v31 = vsub.f32 %v579_v24, %v611_v26  ;;  %v421_v32 = vsub.f32 %v599_v21, %v631_v29  ;;  %vm226_vm8 = vcmp.eq.s32.totalorder %v192_v52, %v783_v27  ;;  %vm324_vm11 = vcmp.eq.s32.totalorder %v192_v52, %v788_v28 }
  0x1d   :  { %vm206_vm9 = vcmp.eq.s32.totalorder %v882_v30, %v745_v13  ;;  %vm304_vm10 = vcmp.eq.s32.totalorder %v882_v30, %v754_v17  ;;  %v598_v33 = vsel %vm226_vm8, 1.0, %v677_v22  ;;  %v630_v36 = vsel %vm324_vm11, 1.0, %v677_v22 }
  0x1e   :  { %436 = vmatpush.msra.mxu0 %v401_v31  ;;  %452 = vmatpush.msra.mxu1 %v421_v32  ;;  %v578_v34 = vsel %vm206_vm9, 1.0, %v677_v22  ;;  %v610_v35 = vsel %vm304_vm10, 1.0, %v677_v22  ;;  %v895_v37 = vadd.s32 32, %v725_v8  ;;  %v420_v39 = vsub.f32 %v598_v33, %v630_v36 }
  0x1f   :  { %v400_v38 = vsub.f32 %v578_v34, %v610_v35  ;;  %vm225_vm12 = vcmp.eq.s32.totalorder %v191_v59, %v783_v27  ;;  %vm323_vm13 = vcmp.eq.s32.totalorder %v191_v59, %v788_v28  ;;  %v186_v45 = vadd.s32 24, %v725_v8 }
  0x20   :  { %vm205_vm14 = vcmp.eq.s32.totalorder %v895_v37, %v745_v13  ;;  %vm303_vm15 = vcmp.eq.s32.totalorder %v895_v37, %v754_v17  ;;  %v597_v40 = vsel %vm225_vm12, 1.0, %v677_v22  ;;  %v629_v41 = vsel %vm323_vm13, 1.0, %v677_v22  ;;  %453 = vmatpush.msra.mxu1 %v420_v39 }
  0x21   :  { %437 = vmatpush.msra.mxu0 %v400_v38  ;;  %v577_v42 = vsel %vm205_vm14, 1.0, %v677_v22  ;;  %v609_v43 = vsel %vm303_vm15, 1.0, %v677_v22  ;;  %v419_v44 = vsub.f32 %v597_v40, %v629_v41  ;;  %vm224_vm2 = vcmp.eq.s32.totalorder %v851_v61, %v783_v27 }
  0x22   :  { %v399_v46 = vsub.f32 %v577_v42, %v609_v43  ;;  %vm322_vm3 = vcmp.eq.s32.totalorder %v851_v61, %v788_v28  ;;  %vm204_vm4 = vcmp.eq.s32.totalorder %v186_v45, %v745_v13  ;;  %vm302_vm5 = vcmp.eq.s32.totalorder %v186_v45, %v754_v17 }
  0x23   :  { %454 = vmatpush.msra.mxu1 %v419_v44  ;;  %v596_v47 = vsel %vm224_vm2, 1.0, %v677_v22  ;;  %v628_v48 = vsel %vm322_vm3, 1.0, %v677_v22  ;;  %v576_v49 = vsel %vm204_vm4, 1.0, %v677_v22  ;;  %v608_v50 = vsel %vm302_vm5, 1.0, %v677_v22 }
  0x24   :  { %438 = vmatpush.msra.mxu0 %v399_v46  ;;  %v418_v51 = vsub.f32 %v596_v47, %v628_v48  ;;  %v398_v52 = vsub.f32 %v576_v49, %v608_v50  ;;  %v185_v53 = vadd.s32 16, %v725_v8  ;;  %vm223_vm6 = vcmp.eq.s32.totalorder %v189_v16, %v783_v27 }
  0x25   :  { %vm321_vm7 = vcmp.eq.s32.totalorder %v189_v16, %v788_v28  ;;  %v595_v54 = vsel %vm223_vm6, 1.0, %v677_v22  ;;  %v184_v56 = vadd.s32 8, %v725_v8  ;;  %vm222_vm8 = vcmp.eq.s32.totalorder %v882_v30, %v783_v27 }
  0x26   :  { %455 = vmatpush.msra.mxu1 %v418_v51  ;;  %v627_v55 = vsel %vm321_vm7, 1.0, %v677_v22  ;;  %439 = vmatpush.msra.mxu0 %v398_v52  ;;  %vm203_vm9 = vcmp.eq.s32.totalorder %v185_v53, %v745_v13  ;;  %vm301_vm10 = vcmp.eq.s32.totalorder %v185_v53, %v754_v17  ;;  %v594_v58 = vsel %vm222_vm8, 1.0, %v677_v22 }
  0x27   :  { %v417_v57 = vsub.f32 %v595_v54, %v627_v55  ;;  %v575_v59 = vsel %vm203_vm9, 1.0, %v677_v22  ;;  %v607_v60 = vsel %vm301_vm10, 1.0, %v677_v22  ;;  %vm202_vm11 = vcmp.eq.s32.totalorder %v184_v56, %v745_v13 }
  0x28   :  { %vm300_vm12 = vcmp.eq.s32.totalorder %v184_v56, %v754_v17  ;;  %v397_v61 = vsub.f32 %v575_v59, %v607_v60  ;;  %v574_v62 = vsel %vm202_vm11, 1.0, %v677_v22  ;;  %vm320_vm13 = vcmp.eq.s32.totalorder %v882_v30, %v788_v28 }
  0x29   :  { %456 = vmatpush.msra.mxu1 %v417_v57  ;;  %v606_v63 = vsel %vm300_vm12, 1.0, %v677_v22  ;;  %v626_v4 = vsel %vm320_vm13, 1.0, %v677_v22  ;;  %vm201_vm14 = vcmp.eq.s32.totalorder %v725_v8, %v745_v13  ;;  %v941_v6 = vand.u32 127, %v25_v0 }
  0x2a   :  { %v396_v1 = vsub.f32 %v574_v62, %v606_v63  ;;  %440 = vmatpush.msra.mxu0 %v397_v61  ;;  %v416_v10 = vsub.f32 %v594_v58, %v626_v4  ;;  %v573_v11 = vsel %vm201_vm14, 1.0, %v677_v22  ;;  %vm299_vm15 = vcmp.eq.s32.totalorder %v725_v8, %v754_v17 }
  0x2b   :  { %v605_v16 = vsel %vm299_vm15, 1.0, %v677_v22  ;;  %vm221_vm2 = vcmp.eq.s32.totalorder %v895_v37, %v783_v27  ;;  %vm319_vm3 = vcmp.eq.s32.totalorder %v895_v37, %v788_v28  ;;  %vm220_vm4 = vcmp.eq.s32.totalorder %v186_v45, %v783_v27 }
  0x2c   :  { %441 = vmatpush.msra.mxu0 %v396_v1  ;;  %457 = vmatpush.msra.mxu1 %v416_v10  ;;  %v395_v13 = vsub.f32 %v573_v11, %v605_v16  ;;  %v593_v19 = vsel %vm221_vm2, 1.0, %v677_v22  ;;  %v625_v20 = vsel %vm319_vm3, 1.0, %v677_v22  ;;  %v592_v21 = vsel %vm220_vm4, 1.0, %v677_v22 }
  0x2d   :  { %v415_v17 = vsub.f32 %v593_v19, %v625_v20  ;;  %vm318_vm5 = vcmp.eq.s32.totalorder %v186_v45, %v788_v28  ;;  %vm219_vm6 = vcmp.eq.s32.totalorder %v185_v53, %v783_v27  ;;  %vm317_vm7 = vcmp.eq.s32.totalorder %v185_v53, %v788_v28 }
  0x2e   :  { %442 = vmatpush.msra.mxu0 %v395_v13  ;;  %v624_v23 = vsel %vm318_vm5, 1.0, %v677_v22  ;;  %v591_v24 = vsel %vm219_vm6, 1.0, %v677_v22  ;;  %vm218_vm8 = vcmp.eq.s32.totalorder %v184_v56, %v783_v27  ;;  %v623_v29 = vsel %vm317_vm7, 1.0, %v677_v22 }
  0x2f   :  { %458 = vmatpush.msra.mxu1 %v415_v17  ;;  %443 = vmatmul.f32.vlgmr.msra.gmra.mxu0 %v731_v9  ;;  %v414_v26 = vsub.f32 %v592_v21, %v624_v23  ;;  %v590_v30 = vsel %vm218_vm8, 1.0, %v677_v22  ;;  %vm316_vm9 = vcmp.eq.s32.totalorder %v184_v56, %v788_v28  ;;  %v413_v32 = vsub.f32 %v591_v24, %v623_v29 }
  0x30   :  { %v622_v33 = vsel %vm316_vm9, 1.0, %v677_v22  ;;  %vm217_vm10 = vcmp.eq.s32.totalorder %v725_v8, %v783_v27  ;;  %vm315_vm12 = vcmp.eq.s32.totalorder %v725_v8, %v788_v28  ;;  %v992_v58 = vadd.s32 4294967295, %v740_v12 }
  0x31   :  { %459 = vmatpush.msra.mxu1 %v414_v26  ;;  %v412_v35 = vsub.f32 %v590_v30, %v622_v33  ;;  %v589_v36 = vsel %vm217_vm10, 1.0, %v677_v22  ;;  %v621_v37 = vsel %vm315_vm12, 1.0, %v677_v22  ;;  %v995_v59 = vadd.s32 4294967295, %v706_v2 }
  0x32   :  { %v411_v38 = vsub.f32 %v589_v36, %v621_v37 }
  0x33   :  { %460 = vmatpush.msra.mxu1 %v413_v32  ;;  %vm507_vm12 = vcmp.gt.s32.totalorder %v995_v59, 1 }
  0x35   :  { %461 = vmatpush.msra.mxu1 %v412_v35 }
  0x37   :  { %462 = vmatpush.msra.mxu1 %v411_v38 }
  0x38   :  { %463 = vmatmul.f32.vlgmr.msra.gmra.mxu1 %v760_v18 }
  0x5c   :  { %v144_v15 = vpop.permute.xlu2 %143 }
  0x5d   :  { %v145_v0 = vperm.slane %v144_v15, 0 }
  0x5f   :  { %vm150_vm11 = vcmp.ne.s32.totalorder %v941_v6, %v145_v0 }
  0x60   :  { %vm152_vm14 = vmand %vm27_vm0, %vm150_vm11 }
  0x61   :  { %v154_v22 = vsel %vm152_vm14, 1, %v676_v5  ;;  %vm509_vm14 = vcmp.gt.s32.totalorder %v992_v58, 1 }
  0x62   :  { %v156_v45 = vperm.slane %v154_v22, 0 }
  0x64   :  { %v148_v39 = vpop.permute.xlu2 %147  ;;  %vm158_vm5 = vcmp.eq.s32.totalorder %v156_v45, 1 }
  0x65   :  { %v149_v41 = vperm.slane %v148_v39, 0 }
  0x67   :  { %vm151_vm2 = vcmp.ne.s32.totalorder %v941_v6, %v149_v41 }
  0x68   :  { %vm153_vm4 = vmand %vm28_vm1, %vm151_vm2 }
  0x69   :  { %v155_v52 = vsel %vm153_vm4, 1, %v676_v5 }
  0x6a   :  { %v157_v54 = vperm.slane %v155_v52, 0 }
  0x6c   :  { %vm159_vm8 = vcmp.eq.s32.totalorder %v157_v54, 1 }
  0x74   :  { %v120_v31 = vpop.permute.xlu1 %119 }
  0x75   :  { %v121_v34 = vperm.slane %v120_v31, 0 }
  0x77   :  { %vm126_vm13 = vcmp.ne.s32.totalorder %v941_v6, %v121_v34 }
  0x78   :  { %vm128_vm15 = vmand %vm27_vm0, %vm126_vm13 }
  0x79   :  { %v130_v43 = vsel %vm128_vm15, 1, %v676_v5  ;;  %vm91_vm15 = vcmask 1040384  }
  0x7a   :  { %v132_v46 = vperm.slane %v130_v43, 0 }
  0x7c   :  { %v109_v27 = vpop.xlane.xlu0 %108  ;;  %v124_v28 = vpop.permute.xlu1 %123  ;;  %vm134_vm6 = vcmp.eq.s32.totalorder %v132_v46, 1 }
  0x7d   :  { %v112_v40 = vsub.f32 %v748_v14, %v109_v27  ;;  %v125_v42 = vperm.slane %v124_v28, 0 }
  0x7f   :  { %v114_v44 = vmul.f32 1.442695, %v112_v40  ;;  %vm127_vm3 = vcmp.ne.s32.totalorder %v941_v6, %v125_v42  ;;  %v29_v40 = vrot.slane %v731_v9, 4 }
  0x80   :  { %vm129_vm7 = vmand %vm28_vm1, %vm127_vm3 }
  0x81   :  { %650 = vpow2.f32 %v114_v44  ;;  %v131_v53 = vsel %vm129_vm7, 1, %v676_v5  ;;  %v30_v41 = vmax.f32 %v731_v9, %v29_v40 }
  0x82   :  { %v133_v55 = vperm.slane %v131_v53, 0 }
  0x83   :  { %v31_v28 = vrot.slane %v30_v41, 2 }
  0x84   :  { %v111_v47 = vpop.xlane.xlu0 %110  ;;  %vm135_vm9 = vcmp.eq.s32.totalorder %v133_v55, 1 }
  0x85   :  { %v113_v14 = vsub.f32 %v776_v25, %v111_v47  ;;  %v32_v42 = vmax.f32 %v30_v41, %v31_v28 }
  0x87   :  { %v651_v48 = vpop.eup %650  ;;  %v116_v49 = vmul.f32 1.442695, %v113_v14  ;;  %v33_v22 = vrot.slane %v32_v42, 1  ;;  %v67_v14 = vsel %vm27_vm0, %v711_v3, 0 }
  0x88   :  { %v160_v50 = vsel %vm158_vm5, %v651_v48, 0.0  ;;  %v136_v51 = vsel %vm134_vm6, %v651_v48, 0.0 }
  0x89   :  { %652 = vpow2.f32 %v116_v49  ;;  %162 = vadd.xlane.f32.xlu2 %v160_v50  ;;  %138 = vadd.xlane.f32.xlu0 %v136_v51  ;;  %v34_v43 = vmax.f32 %v32_v42, %v33_v22  ;;  %v69_v50 = vperm.slane %v67_v14, 0 }
  0x8b   :  { %v41_v44 = vsub.f32 %v731_v9, %v34_v43  ;;  %vm71_vm13 = vcmp.eq.s32.totalorder %v725_v8, %v69_v50 }
  0x8c   :  { %v73_v54 = vsel %vm71_vm13, %v731_v9, 0.0  ;;  %vm564_vm13 = vcmask 8192  }
  0x8d   :  { %v43_v45 = vmul.f32 1.442695, %v41_v44  ;;  %v75_v55 = vrot.slane %v73_v54, 4 }
  0x8f   :  { %v653_v56 = vpop.eup %652 }
  0x90   :  { %v161_v25 = vsel %vm159_vm8, %v653_v56, 0.0  ;;  %v137_v57 = vsel %vm135_vm9, %v653_v56, 0.0  ;;  %v508_v56 = vsel %vm507_vm12, %v995_v59, 1  ;;  %vm515_vm9 = vcmp.gt.s32.totalorder %v995_v59, 0 }
  0x91   :  { %164 = vadd.xlane.f32.xlu0 %v161_v25  ;;  %140 = vadd.xlane.f32.xlu1 %v137_v57  ;;  %v76_v25 = vadd.f32 %v75_v55, %v73_v54  ;;  %v511_v57 = vcvt.s32.f32 %v508_v56  ;;  %vm549_vm12 = vcmp.eq.s32.totalorder %v941_v6, 0 }
  0xa1   :  { %480 = vperm.xlu2 %644, %v992_v58  }
  0xa5   :  { %476 = vperm.xlu0 %643, %v995_v59  }
  0xac   :  { %v444_v0 = vpop.f32.mrf.mxu0 }
  0xb5   :  { %v464_v23 = vpop.f32.mrf.mxu1 }
  0xfc   :  { %v163_v5 = vpop.xlane.xlu2 %162  ;;  %v139_v60 = vpop.xlane.xlu0 %138 }
  0xfd   :  { %v172_v61 = vmax.f32 %v163_v5, 1e-30  ;;  %v166_v62 = vmax.f32 %v139_v60, 1e-30  ;;  %v77_v5 = vrot.slane %v76_v25, 2 }
  0xff   :  { %654 = vlog2.f32 %v172_v61  ;;  %v78_v60 = vadd.f32 %v77_v5, %v76_v25 }
 0x100   :  { %656 = vlog2.f32 %v166_v62  ;;  %v513_v62 = vmul.f32 8.0, %v511_v57 }
 0x102   :  { %v526_v40 = vand.u32 2147483647, %v513_v62 }
 0x104   :  { %v165_v63 = vpop.xlane.xlu0 %164  ;;  %v141_v1 = vpop.xlane.xlu1 %140  ;;  %vm527_vm5 = vcmp.eq.f32.partialorder %v526_v40, 8.507059e+37 }
 0x105   :  { %v655_v4 = vpop.eup %654  ;;  %v173_v10 = vmax.f32 %v165_v63, 1e-30  ;;  %v167_v11 = vmax.f32 %v141_v1, 1e-30  ;;  %v481_v35 = vpop.permute.xlu2 %480  ;;  %v510_v63 = vsel %vm509_vm14, %v992_v58, 1 }
 0x106   :  { %v657_v12 = vpop.eup %656  ;;  %v175_v15 = vmul.f32 0.6931472, %v655_v4  ;;  %v482_v38 = vperm.slane %v481_v35, 0  ;;  %v79_v4 = vrot.slane %v78_v60, 1 }
 0x107   :  { %v169_v16 = vmul.f32 0.6931472, %v657_v12  ;;  %658 = vlog2.f32 %v173_v10  ;;  %v512_v10 = vcvt.s32.f32 %v510_v63 }
 0x108   :  { %660 = vlog2.f32 %v167_v11  ;;  %vm484_vm11 = vcmp.lt.s32.totalorder %v941_v6, %v482_v38  ;;  %v80_v12 = vadd.f32 %v79_v4, %v78_v60 }
 0x109   :  { %v178_v2 = vsub.f32 %v169_v16, %v175_v15  ;;  %662 = vpow2.f32 %v43_v45  ;;  %v35_v15 = vrot.slane %v760_v18, 4  ;;  %v1014_v16 = vmul.f32 8.0, %v512_v10 }
 0x10b   :  { %v467_v19 = vsub.f32 %v444_v0, %v178_v2  ;;  %vm537_vm6 = vweird.f32 %v1014_v16  ;;  %v541_v56 = vand.u32 2147483647, %v1014_v16 }
 0x10d   :  { %v659_v13 = vpop.eup %658  ;;  %v469_v24 = vmul.f32 %v467_v19, %v467_v19 }
 0x10e   :  { %v661_v20 = vpop.eup %660  ;;  %v177_v17 = vmul.f32 0.6931472, %v659_v13  ;;  %v36_v13 = vmax.f32 %v760_v18, %v35_v15 }
 0x10f   :  { %v171_v21 = vmul.f32 0.6931472, %v661_v20  ;;  %v471_v30 = vmax.f32 %v469_v24, 0.0  ;;  %v663_v46 = vpop.eup %662  ;;  %v68_v24 = vsel %vm28_vm1, %v722_v7, 0 }
 0x110   :  { %v47_v47 = vrot.slane %v663_v46, 4  ;;  %v37_v20 = vrot.slane %v36_v13, 2 }
 0x111   :  { %v179_v26 = vsub.f32 %v171_v21, %v177_v17  ;;  %v473_v34 = vmin.f32 %v471_v30, 16.0  ;;  %v70_v30 = vperm.slane %v68_v24, 0 }
 0x112   :  { %v48_v48 = vadd.f32 %v663_v46, %v47_v47  ;;  %v38_v21 = vmax.f32 %v36_v13, %v37_v20 }
 0x113   :  { %v468_v29 = vsub.f32 %v464_v23, %v179_v26  ;;  %vm72_vm3 = vcmp.eq.s32.totalorder %v725_v8, %v70_v30 }
 0x114   :  { %v49_v49 = vrot.slane %v48_v48, 2  ;;  %v39_v23 = vrot.slane %v38_v21, 1  ;;  %v74_v28 = vsel %vm72_vm3, %v760_v18, 0.0 }
 0x115   :  { %v470_v31 = vmul.f32 %v468_v29, %v468_v29  ;;  %v81_v8 = vrot.slane %v74_v28, 4 }
 0x116   :  { %v50_v51 = vadd.f32 %v49_v49, %v48_v48  ;;  %v1024_v3 = vmax.f32 %v38_v21, %v39_v23 }
 0x117   :  { %v477_v32 = vpop.permute.xlu0 %476  ;;  %v472_v36 = vmax.f32 %v470_v31, 0.0  ;;  %v82_v25 = vadd.f32 %v81_v8, %v74_v28 }
 0x118   :  { %v478_v33 = vperm.slane %v477_v32, 0  ;;  %v51_v52 = vrot.slane %v50_v51, 1  ;;  %v42_v31 = vsub.f32 %v760_v18, %v1024_v3  ;;  %v543_v18 = vand.u32 2147483648, %v1014_v16 }
 0x119   :  { %v474_v39 = vmin.f32 %v472_v36, 16.0  ;;  %v83_v10 = vrot.slane %v82_v25, 2 }
 0x11a   :  { %vm483_vm10 = vcmp.lt.s32.totalorder %v941_v6, %v478_v33  ;;  %v52_v53 = vadd.f32 %v51_v52, %v50_v51 }
 0x11b   :  { %v489_v37 = vsel %vm483_vm10, %v473_v34, 0.0  ;;  %v490_v27 = vsel %vm484_vm11, %v474_v39, 0.0  ;;  %v45_v34 = vmul.f32 1.442695, %v42_v31  ;;  %vm542_vm10 = vcmp.eq.f32.partialorder %v541_v56, 8.507059e+37 }
 0x11c   :  { %491 = vadd.xlane.f32.xlu1 %v489_v37  ;;  %664 = vlog2.f32 %v52_v53  ;;  %v528_v37 = vand.u32 2147483648, %v513_v62  ;;  %vm516_vm11 = vcmp.gt.s32.totalorder %v992_v58, 0 }
 0x11d   :  { %666 = vrcp.f32 %v513_v62 }
 0x11e   :  { %668 = vrcp.f32 %v1014_v16  ;;  %v529_v22 = vor.u32 1.1754944e-38, %v528_v37 }
 0x11f   :  { %670 = vpow2.f32 %v45_v34 }
 0x122   :  { %v665_v61 = vpop.eup %664 }
 0x123   :  { %v60_v1 = vmul.f32 0.6931472, %v665_v61  ;;  %v667_v19 = vpop.eup %666 }
 0x124   :  { %493 = vadd.xlane.f32.xlu1 %v490_v27  ;;  %v518_v17 = vmul.f32 %v667_v19, %v513_v62  ;;  %v669_v26 = vpop.eup %668  ;;  %vm523_vm2 = vweird.f32 %v667_v19 }
 0x125   :  { %v63_v11 = vadd.f32 %v60_v1, %v34_v43  ;;  %v533_v32 = vmul.f32 %v669_v26, %v1014_v16  ;;  %v671_v44 = vpop.eup %670  ;;  %vm538_vm7 = vweird.f32 %v669_v26 }
 0x126   :  { %v519_v29 = vsub.f32 1.0, %v518_v17  ;;  %v53_v14 = vrot.slane %v671_v44, 4  ;;  %vm1039_vm8 = vmor %vm537_vm6, %vm538_vm7 }
 0x127   :  { %v87_v9 = vsub.f32 %v63_v11, %v80_v12  ;;  %v534_v38 = vsub.f32 1.0, %v533_v32 }
 0x128   :  { %v520_v33 = vmul.f32 %v667_v19, %v519_v29  ;;  %v54_v52 = vadd.f32 %v671_v44, %v53_v14 }
 0x129   :  { %v89_v2 = vsel %vm27_vm0, %v87_v9, 0.0  ;;  %vm522_vm0 = vweird.f32 %v513_v62  ;;  %v535_v43 = vmul.f32 %v669_v26, %v534_v38  ;;  %v544_v62 = vor.u32 1.1754944e-38, %v543_v18 }
 0x12a   :  { %v92_v0 = vsel %vm91_vm15, %v89_v2, 0.0  ;;  %v521_v27 = vadd.f32 %v667_v19, %v520_v33  ;;  %vm1030_vm4 = vmor %vm522_vm0, %vm523_vm2  ;;  %v55_v57 = vrot.slane %v54_v52, 2  ;;  %v84_v2 = vadd.f32 %v83_v10, %v82_v25 }
 0x12b   :  { %93 = vadd.xlane.f32.xlu0 %v92_v0  ;;  %v536_v51 = vadd.f32 %v669_v26, %v535_v43 }
 0x12c   :  { %v525_v46 = vsel %vm1030_vm4, %v667_v19, %v521_v27  ;;  %v56_v63 = vadd.f32 %v55_v57, %v54_v52  ;;  %v85_v13 = vrot.slane %v84_v2, 1 }
 0x12d   :  { %v530_v50 = vsel %vm527_vm5, %v529_v22, %v525_v46  ;;  %v540_v61 = vsel %vm1039_vm8, %v669_v26, %v536_v51 }
 0x12e   :  { %v57_v11 = vrot.slane %v56_v63, 1  ;;  %v545_v9 = vsel %vm542_vm10, %v544_v62, %v540_v61  ;;  %v86_v17 = vadd.f32 %v85_v13, %v84_v2 }
 0x130   :  { %v58_v15 = vadd.f32 %v57_v11, %v56_v63 }
 0x132   :  { %672 = vlog2.f32 %v58_v15 }
 0x138   :  { %v673_v19 = vpop.eup %672 }
 0x139   :  { %v62_v20 = vmul.f32 0.6931472, %v673_v19 }
 0x13b   :  { %v64_v21 = vadd.f32 %v62_v20, %v1024_v3 }
 0x13d   :  { %v88_v23 = vsub.f32 %v64_v21, %v86_v17 }
 0x13f   :  { %v90_v24 = vsel %vm28_vm1, %v88_v23, 0.0 }
 0x140   :  { %v95_v26 = vsel %vm91_vm15, %v90_v24, 0.0 }
 0x18f   :  { %v492_v35 = vpop.xlane.xlu1 %491 }
 0x190   :  { %v495_v36 = vrot.slane %v492_v35, 4 }
 0x192   :  { %v496_v39 = vadd.f32 %v495_v36, %v492_v35 }
 0x194   :  { %v497_v42 = vrot.slane %v496_v39, 2 }
 0x196   :  { %v498_v45 = vadd.f32 %v497_v42, %v496_v39 }
 0x197   :  { %v494_v47 = vpop.xlane.xlu1 %493 }
 0x198   :  { %v499_v48 = vrot.slane %v498_v45, 1  ;;  %v501_v49 = vrot.slane %v494_v47, 4 }
 0x19a   :  { %v502_v53 = vadd.f32 %v501_v49, %v494_v47  ;;  %v500_v54 = vadd.f32 %v499_v48, %v498_v45 }
 0x19c   :  { %v503_v5 = vrot.slane %v502_v53, 2  ;;  %v531_v60 = vmul.f32 %v530_v50, %v500_v54 }
 0x19e   :  { %v504_v1 = vadd.f32 %v503_v5, %v502_v53  ;;  %v547_v4 = vsel %vm515_vm9, %v531_v60, 0.0  ;;  %v94_v58 = vpop.xlane.xlu0 %93 }
 0x19f   :  { %552 = vperm.xlu1 %645, %v547_v4  }
 0x1a0   :  { %v505_v12 = vrot.slane %v504_v1, 1 }
 0x1a2   :  { %v506_v16 = vadd.f32 %v505_v12, %v504_v1 }
 0x1a4   :  { %v546_v59 = vmul.f32 %v545_v9, %v506_v16 }
 0x1a6   :  { %v548_v0 = vsel %vm516_vm11, %v546_v59, 0.0 }
 0x1a7   :  { %558 = vperm.xlu2 %644, %v548_v0  }
 0x1d0   :  { %96 = vadd.xlane.f32.xlu2 %v95_v26 }
 0x201   :  { %v559_v32 = vpop.permute.xlu2 %558 }
 0x202   :  { %v561_v3 = vperm.slane %v559_v32, 0 }
 0x211   :  { %v553_v29 = vpop.permute.xlu1 %552 }
 0x212   :  { %v555_v30 = vperm.slane %v553_v29, 0 }
 0x214   :  { %v562_v31 = vsel %vm549_vm12, %v94_v58, %v555_v30 }
 0x215   :  { %565 = vst.msk [vmem:[%s1063_s4] sm:$0x1] %vm564_vm13, %v562_v31 }
 0x243   :  { %v97_v33 = vpop.xlane.xlu2 %96 }
 0x244   :  { %v563_v34 = vsel %vm549_vm12, %v97_v33, %v561_v3 }
 0x245   :  { %566 = vst.msk [vmem:[%s1063_s4 + $0x1] sm:$0x1] %vm564_vm13, %v563_v34 }

</bundles_post_ra>
